<compile_context>
chip_gen: v7x
topology: tpu7x:2x2x1
jax: 0.10.0
libtpu: 0.0.40
codegen_flags: <defaults>
</compile_context>

<pallas_src>
import functools

import jax
import jax.numpy as jnp
from jax import lax
from jax.experimental import pallas as pl
from jax.experimental.pallas import tpu as pltpu

_LANE = 128


def _pad_to(n: int, m: int) -> int:
    return ((n + m - 1) // m) * m


def _vmem_capacity_bytes() -> int:
    """Per-TensorCore VMEM capacity; conservative (v7x) fallback."""
    try:
        info = pltpu.get_tpu_info()
        for name in ("vmem_capacity_bytes", "vmem_size_bytes", "vmem_bytes"):
            cap = getattr(info, name, None)
            if cap:
                return int(cap)
    except Exception:
        pass
    return 64 << 20


def _round_tb(tb: int, rows: int) -> int:
    """Row tile: full rows (always legal) or (8 | 128)-aligned."""
    if tb >= rows:
        return rows
    if tb >= 128:
        return (tb // 128) * 128
    return max((tb // 8) * 8, 8)


def _plan(rows, in_eff, out_p, itemsize, residual, block_batch, block_k, vmem_cap):
    """Pick (tb, tn, tk). tk=None means whole-K (2D grid)."""
    big_vmem = vmem_cap >= (100 << 20)          # v5e / v6e: 128 MiB; v7x: 64 MiB
    data_budget = (56 << 20) if big_vmem else (22 << 20)

    if big_vmem and out_p % 512 == 0:
        tn = 512                                # fewer W DMAs on 128-MiB parts
    elif out_p % 256 == 0:
        tn = 256
    else:
        tn = _LANE

    in_lane = _pad_to(in_eff, _LANE)            # VMEM lane footprint of a K row
    tb_cap = 1024 if block_batch is None else max(int(block_batch), 1)

    # --- whole-K sizing (x tile + out tile double-buffered, W tile, f32 temps) ---
    w_bytes = 2 * tn * (in_lane + 1) * itemsize
    row_bytes = 2 * (in_lane + tn) * itemsize + 2 * tn * 4
    tb_whole = max((data_budget - w_bytes) // row_bytes, 8)
    tb_whole = min(rows, tb_cap, tb_whole)

    use_kt = (block_k is not None) or (tb_whole < 256 and rows >= 256 and in_lane >= 1024)
    if not use_kt:
        tb = _round_tb(tb_whole, rows)
        # v7x has 2 TensorCores sharded over parallel axes: avoid a (1,1) grid
        # for compute-heavy single-tile shapes.
        if rows > 256 and pl.cdiv(rows, tb) == 1 and out_p // tn == 1:
            tb = _round_tb(max(tb // 2, 8), rows)
        return tb, tn, None

    # --- K-tiled sizing (adds f32 accumulator + optional residual tile) ---
    tk = int(block_k) if block_k is not None else 512
    tk = max(_LANE, (tk // _LANE) * _LANE)
    tk = min(tk, in_lane)
    w_bytes = 2 * tn * (tk + 1) * itemsize
    row_bytes = (2 * (tk + tn) * itemsize        # x chunk + out tile, double-buffered
                 + tn * 4                        # f32 accumulator
                 + 2 * tn * 4                    # epilogue temporaries
                 + (2 * tn * itemsize if residual else 0))   # residual x view
    tb = max((data_budget - w_bytes) // row_bytes, 8)
    tb = _round_tb(min(rows, tb_cap, tb), rows)
    return tb, tn, tk


def _rb_kernel_2d(x_ref, w_ref, b_ref, o_ref, *,
                  residual, col_axis, n_col_tiles, tn,
                  negative_slope, mxu_bf16):
    x = x_ref[...]                                   # (tb, in_eff)
    a, w = x, w_ref[...]
    if mxu_bf16:
        a = a.astype(jnp.bfloat16)
        w = w.astype(jnp.bfloat16)
    # x @ W^T: contract last dims of both operands (torch weight layout).
    y = lax.dot_general(a, w, dimension_numbers=(((1,), (1,)), ((), ())),
                        preferred_element_type=jnp.float32)
    y = y + b_ref[...].astype(jnp.float32)           # (1, tn) broadcasts
    y = jnp.where(y > 0, y, negative_slope * y)      # LeakyReLU
    if residual:
        if n_col_tiles == 1:
            xr = x                                   # widths match (in_eff == tn)
        else:
            # Residual slice comes from the x tile already resident in VMEM.
            start = pl.multiple_of(pl.program_id(col_axis) * tn, _LANE)
            xr = x_ref[:, pl.ds(start, tn)]
        y = y + xr.astype(jnp.float32)
    o_ref[...] = y.astype(o_ref.dtype)


def _rb_kernel_kt(*refs, residual, negative_slope, mxu_bf16):
    if residual:
        x_ref, w_ref, b_ref, xres_ref, o_ref, acc_ref = refs
    else:
        x_ref, w_ref, b_ref, o_ref, acc_ref = refs
        xres_ref = None
    k = pl.program_id(2)

    @pl.when(k == 0)
    def _init():
        acc_ref[...] = jnp.zeros_like(acc_ref)

    a, w = x_ref[...], w_ref[...]
    if mxu_bf16:
        a = a.astype(jnp.bfloat16)
        w = w.astype(jnp.bfloat16)
    acc_ref[...] += lax.dot_general(a, w, dimension_numbers=(((1,), (1,)), ((), ())),
                                    preferred_element_type=jnp.float32)

    @pl.when(k == pl.num_programs(2) - 1)
    def _finalize():
        y = acc_ref[...] + b_ref[...].astype(jnp.float32)
        y = jnp.where(y > 0, y, negative_slope * y)
        if residual:
            y = y + xres_ref[...].astype(jnp.float32)
        o_ref[...] = y.astype(o_ref.dtype)


def residual_block(x, weight, bias, *, block_batch=None, block_k=None, mxu_bf16=False):
    """Pallas TPU forward of ResidualBlock.

    Args:
      x:      (..., input_dim)
      weight: (output_dim, input_dim)  -- PyTorch nn.Linear layout (untransposed)
      bias:   (output_dim,)
      block_batch: optional row-tile override.
      block_k:     optional K-tile override (forces the K-tiled accumulator path).
      mxu_bf16:    cast matmul operands to bf16 (f32 accumulation) for MXU rate.
    Returns:
      (..., output_dim), same dtype as x.
    """
    orig_shape = x.shape
    input_dim = int(orig_shape[-1])
    output_dim, w_in = int(weight.shape[0]), int(weight.shape[1])
    assert w_in == input_dim, "weight shape mismatch"
    residual = (input_dim == output_dim)
    negative_slope = 0.01                         # nn.LeakyReLU default

    x2 = x.reshape(-1, input_dim)
    rows = int(x2.shape[0])
    itemsize = jnp.dtype(x.dtype).itemsize

    out_p = _pad_to(output_dim, _LANE)            # lane-dense stores
    # Keep K ragged (full-last-dim blocks are exempt from the 128 rule) unless the
    # residual add needs x columns aligned with the 128-padded output columns.
    pad_k = residual and (input_dim % _LANE != 0)
    in_eff = out_p if pad_k else input_dim

    vmem_cap = _vmem_capacity_bytes()
    big_vmem = vmem_cap >= (100 << 20)
    vmem_limit = (96 << 20) if big_vmem else (48 << 20)

    tb, tn, tk = _plan(rows, in_eff, out_p, itemsize, residual,
                       block_batch, block_k, vmem_cap)
    in_work = in_eff if tk is None else _pad_to(in_eff, tk)

    if in_work != input_dim:
        x2 = jnp.pad(x2, ((0, 0), (0, in_work - input_dim)))
    w_p = weight
    if (out_p != output_dim) or (in_work != input_dim):
        w_p = jnp.pad(weight, ((0, out_p - output_dim), (0, in_work - input_dim)))
    b_p = bias if out_p == output_dim else jnp.pad(bias, (0, out_p - output_dim))
    b2d = b_p.reshape(1, out_p)

    n_row_tiles = pl.cdiv(rows, tb)
    n_col_tiles = out_p // tn
    flops = 2 * rows * in_work * out_p

    if tk is None:
        # ---------------- 2D whole-K path, adaptive loop order ----------------
        w_stream = out_p * in_work
        x_stream = rows * in_work
        # Keep the larger re-streamed operand resident across the inner loop.
        rows_inner = (n_col_tiles - 1) * x_stream < (n_row_tiles - 1) * w_stream
        if rows_inner:
            grid = (n_col_tiles, n_row_tiles)      # W tile resident, x re-streamed
            col_axis = 0
            x_spec = pl.BlockSpec((tb, in_work), lambda j, i: (i, 0))
            w_spec = pl.BlockSpec((tn, in_work), lambda j, i: (j, 0))
            b_spec = pl.BlockSpec((1, tn), lambda j, i: (0, j))
            o_spec = pl.BlockSpec((tb, tn), lambda j, i: (i, j))
            streamed = n_col_tiles * x_stream + w_stream
        else:
            grid = (n_row_tiles, n_col_tiles)      # x tile resident, W re-streamed
            col_axis = 1
            x_spec = pl.BlockSpec((tb, in_work), lambda i, j: (i, 0))
            w_spec = pl.BlockSpec((tn, in_work), lambda i, j: (j, 0))
            b_spec = pl.BlockSpec((1, tn), lambda i, j: (0, j))
            o_spec = pl.BlockSpec((tb, tn), lambda i, j: (i, j))
            streamed = x_stream + n_row_tiles * w_stream

        kernel = functools.partial(
            _rb_kernel_2d, residual=residual, col_axis=col_axis,
            n_col_tiles=n_col_tiles, tn=tn,
            negative_slope=negative_slope, mxu_bf16=mxu_bf16)
        bytes_accessed = itemsize * (streamed + out_p + rows * out_p)

        out = pl.pallas_call(
            kernel,
            out_shape=jax.ShapeDtypeStruct((rows, out_p), x.dtype),
            grid_spec=pltpu.PrefetchScalarGridSpec(
                num_scalar_prefetch=0,
                grid=grid,
                in_specs=[x_spec, w_spec, b_spec],
                out_specs=o_spec),
            compiler_params=pltpu.CompilerParams(
                dimension_semantics=("parallel", "parallel"),
                vmem_limit_bytes=vmem_limit),
            cost_estimate=pl.CostEstimate(flops=int(flops), transcendentals=0,
                                          bytes_accessed=int(bytes_accessed)),
        )(x2, w_p, b2d)
    else:
        # -------------- 3D K-tiled path with f32 VMEM accumulator --------------
        n_k_tiles = in_work // tk
        in_specs = [
            pl.BlockSpec((tb, tk), lambda i, j, k: (i, k)),     # x K-chunk
            pl.BlockSpec((tn, tk), lambda i, j, k: (j, k)),     # W K-chunk (torch layout)
            pl.BlockSpec((1, tn), lambda i, j, k: (0, j)),      # bias tile
        ]
        operands = [x2, w_p, b2d]
        if residual:
            # Residual view of x; block index constant over k, so it is DMA'd once
            # per (i, j) tile, not per K step.
            in_specs.append(pl.BlockSpec((tb, tn), lambda i, j, k: (i, j)))
            operands.append(x2)

        kernel = functools.partial(_rb_kernel_kt, residual=residual,
                                   negative_slope=negative_slope, mxu_bf16=mxu_bf16)
        bytes_accessed = itemsize * (n_col_tiles * rows * in_work
                                     + n_row_tiles * out_p * in_work
                                     + out_p + rows * out_p
                                     + (rows * out_p if residual else 0))

        out = pl.pallas_call(
            kernel,
            out_shape=jax.ShapeDtypeStruct((rows, out_p), x.dtype),
            grid_spec=pltpu.PrefetchScalarGridSpec(
                num_scalar_prefetch=0,
                grid=(n_row_tiles, n_col_tiles, n_k_tiles),
                in_specs=in_specs,
                out_specs=pl.BlockSpec((tb, tn), lambda i, j, k: (i, j)),
                scratch_shapes=[pltpu.VMEM((tb, tn), jnp.float32)]),
            compiler_params=pltpu.CompilerParams(
                dimension_semantics=("parallel", "parallel", "arbitrary"),
                vmem_limit_bytes=vmem_limit),
            cost_estimate=pl.CostEstimate(flops=int(flops), transcendentals=0,
                                          bytes_accessed=int(bytes_accessed)),
        )(*operands)

    if out_p != output_dim:
        # TODO(synk): let downstream consumers accept the 128-padded layout (or fuse
        # this slice into the next op) to avoid an extra HBM pass over the output.
        out = out[:, :output_dim]
    return out.reshape(orig_shape[:-1] + (output_dim,))


def _reference(x, weight, bias):
    y = jnp.einsum("...i,oi->...o", x, weight,
                   precision=jax.lax.Precision.HIGHEST) + bias
    y = jnp.where(y > 0, y, 0.01 * y)
    if weight.shape[0] == weight.shape[1]:
        y = x + y
    return y


if __name__ == "__main__":
    key = jax.random.PRNGKey(0)

    def make_case(k, batch_shape, input_dim, output_dim):
        k_x, k_w, k_b = jax.random.split(k, 3)
        bound = 1.0 / (input_dim ** 0.5)
        x = jax.random.normal(k_x, batch_shape + (input_dim,), dtype=jnp.float32)
        w = jax.random.uniform(k_w, (output_dim, input_dim),
                               minval=-bound, maxval=bound, dtype=jnp.float32)
        b = jax.random.uniform(k_b, (output_dim,),
                               minval=-bound, maxval=bound, dtype=jnp.float32)
        return x, w, b

    # (batch_shape, input_dim, output_dim, kwargs, atol, rtol)
    cases = [
        ((8,), 32, 32, {}, 2e-5, 2e-5),                     # residual, lane-padded dims
        ((2, 4), 32, 64, {}, 2e-5, 2e-5),                   # ragged K (no wrapper pad), no residual
        ((16,), 384, 384, {}, 2e-5, 2e-5),                  # residual, in-kernel slice (cols inner)
        ((64,), 384, 384, {"block_batch": 8}, 2e-5, 2e-5),  # swapped grid order (rows inner)
        ((32,), 256, 256, {"block_k": 128}, 2e-5, 2e-5),    # K-tiled accumulator + residual view
        ((64,), 256, 128, {"block_k": 128}, 2e-5, 2e-5),    # K-tiled, no residual
        ((16,), 256, 256, {"mxu_bf16": True}, 1e-1, 1e-1),  # bf16 MXU path (loose tolerance)
    ]
    keys = jax.random.split(key, len(cases))
    for k, (bshape, din, dout, kw, atol, rtol) in zip(keys, cases):
        x, w, b = make_case(k, bshape, din, dout)
        out = jax.block_until_ready(residual_block(x, w, b, **kw))
        ref = _reference(x, w, b)
        assert out.shape == bshape + (dout,)
        assert jnp.allclose(out, ref, atol=atol, rtol=rtol), \
            f"mismatch vs reference for case {(bshape, din, dout, kw)}"

    print("KERNEL_OK")
</pallas_src>

<mosaic_0001>
module attributes {stable_mosaic.version = 11 : i64} {
  func.func @_rb_kernel_2d(%arg0: i32, %arg1: i32, %arg2: memref<8x128xf32, #tpu.memory_space<vmem>>, %arg3: memref<128x128xf32, #tpu.memory_space<vmem>>, %arg4: memref<1x128xf32, #tpu.memory_space<vmem>>, %arg5: memref<8x128xf32, #tpu.memory_space<vmem>>) attributes {dimension_semantics = [#tpu.dimension_semantics<parallel>, #tpu.dimension_semantics<parallel>], iteration_bounds = array<i64: 1, 1>, scalar_prefetch = 0 : i64, scratch_operands = 0 : i64, tpu.core_type = #tpu.core_type<tc>, window_params = [{transform_indices = @transform_0, window_bounds = array<i64: 8, 128>}, {transform_indices = @transform_1, window_bounds = array<i64: 128, 128>}, {transform_indices = @transform_2, window_bounds = array<i64: 1, 128>}, {transform_indices = @transform_3, window_bounds = array<i64: 8, 128>}]} {
    %c0 = arith.constant 0 : index
    %c0_0 = arith.constant 0 : index
    %0 = vector.load %arg2[%c0, %c0_0] : memref<8x128xf32, #tpu.memory_space<vmem>>, vector<8x128xf32>
    %c0_1 = arith.constant 0 : index
    %c0_2 = arith.constant 0 : index
    %1 = vector.load %arg3[%c0_1, %c0_2] : memref<128x128xf32, #tpu.memory_space<vmem>>, vector<128x128xf32>
    %cst = arith.constant dense<0.000000e+00> : vector<8x128xf32>
    %2 = tpu.matmul %0, %1, %cst {dimension_numbers = #tpu.dot_dimension_numbers<[1], [1], [0], [0], [0, 0, 1, 0], [], []>} : vector<8x128xf32>, vector<128x128xf32>, vector<8x128xf32> -> vector<8x128xf32>
    %c0_3 = arith.constant 0 : index
    %c0_4 = arith.constant 0 : index
    %3 = vector.load %arg4[%c0_3, %c0_4] : memref<1x128xf32, #tpu.memory_space<vmem>>, vector<1x128xf32>
    %4 = vector.broadcast %3 : vector<1x128xf32> to vector<8x128xf32>
    %5 = arith.addf %2, %4 : vector<8x128xf32>
    %cst_5 = arith.constant 0.000000e+00 : f32
    %6 = vector.broadcast %cst_5 : f32 to vector<8x128xf32>
    %7 = arith.cmpf ogt, %5, %6 : vector<8x128xf32>
    %cst_6 = arith.constant 0.00999999977 : f32
    %8 = vector.broadcast %cst_6 : f32 to vector<8x128xf32>
    %9 = arith.mulf %8, %5 : vector<8x128xf32>
    %10 = arith.select %7, %5, %9 : vector<8x128xi1>, vector<8x128xf32>
    %11 = arith.addf %10, %0 : vector<8x128xf32>
    %c0_7 = arith.constant 0 : index
    %c0_8 = arith.constant 0 : index
    %12 = vector.load %arg5[%c0_7, %c0_8] : memref<8x128xf32, #tpu.memory_space<vmem>>, vector<8x128xf32>
    tpu.vector_store %arg5[%c0_7, %c0_8], %11 {strides = array<i32>} : memref<8x128xf32, #tpu.memory_space<vmem>>, vector<8x128xf32>,
    return
  }
  func.func @transform_0(%arg0: i32, %arg1: i32) -> (i32, i32) {
    %c0_i32 = arith.constant 0 : i32
    %c0_i32_0 = arith.constant 0 : i32
    return %arg0, %c0_i32 : i32, i32
  }
  func.func @transform_1(%arg0: i32, %arg1: i32) -> (i32, i32) {
    %c0_i32 = arith.constant 0 : i32
    %c0_i32_0 = arith.constant 0 : i32
    return %arg1, %c0_i32 : i32, i32
  }
  func.func @transform_2(%arg0: i32, %arg1: i32) -> (i32, i32) {
    %c0_i32 = arith.constant 0 : i32
    %c0_i32_0 = arith.constant 0 : i32
    return %c0_i32, %arg1 : i32, i32
  }
  func.func @transform_3(%arg0: i32, %arg1: i32) -> (i32, i32) {
    %c0_i32 = arith.constant 0 : i32
    return %arg0, %arg1 : i32, i32
  }
}

</mosaic_0001>

<bundles_post_ra>
// kernel: tpu_custom_call.1
= control target key start
LH: loop header
LB: loop body
LE: loop exit
PB: predicated region body
PF: predicated region fallthrough
CT: control target
= control target key end

     0   :  { %8 = vsyncpa [#allocation3], 0  ;;  %s387_s0 = inlined_call_operand.hbm [shape: f32[8,128], index: 0, kind: input, shape index: {}]   ;;  %s388_s1 = inlined_call_operand.hbm [shape: f32[128,128], index: 1, kind: input, shape index: {}]   ;;  %s389_s2 = inlined_call_operand.vmem [shape: f32[1,128], index: 2, kind: input, shape index: {}]   ;;  %s390_s3 = inlined_call_operand.hbm [shape: f32[8,128], index: 3, kind: output, shape index: {}]  }
   0x1   :  { %9 = vsyncpa [#allocation6], 0 }
   0x2   :  { %10 = vsyncpa [#allocation4], 0  ;;  %s313_s12 = smov [#allocation2]   ;;  %s314_s14 = smov [#allocation5]  }
   0x3   :  { %s17_s13 = sshll.u32 %s313_s12, 4  ;;  %s26_s15 = sshll.u32 %s314_s14, 4  ;;  %s18_s13 = int_to_ptr.vmem [resolvable:$true] %s17_s13  ;;  %s341_s15 = int_to_ptr.vmem [resolvable:$true] %s26_s15 }
   0x4   :  { %s241_s18 = scalar_lea.hbm %s387_s0, 128 }
   0x5   :  { %p242_p0 = scmp.ne.s32.totalorder %s387_s0, %s241_s18  ;;  %p245_p1 = scmp.lt.u32.totalorder %s241_s18, %s387_s0 }
   0x7   :  { %p247_p2 = pnand %p245_p1, %p242_p0 }
   0x9   :  { %250 = shalt.err (!%p247_p2)
}
   0xa   :  { %s251_s23 = scalar_lea.vmem %s18_s13, 128  ;;  %p256_p4 = scmp.lt.s32.totalorder %s18_s13, %s18_s13 }
   0xb   :  { %p252_p3 = scmp.ne.s32.totalorder %s18_s13, %s251_s23  ;;  %p257_p5 = scmp.lt.s32.totalorder %s251_s23, %s251_s23 }
   0xd   :  { %p258_p6 = por %p257_p5, %p256_p4 }
   0xf   :  { %p259_p7 = pnand %p258_p6, %p252_p3 }
  0x11   :  { %262 = shalt.err (!%p259_p7)
}
  0x12   :  { %20 = dma.hbm_to_vmem [thread:$0]  %s387_s0, 128, %s18_s13, [#allocation3]  }
  0x13   :  { %s263_s28 = scalar_lea.hbm %s388_s1, 2048 }
  0x14   :  { %p264_p8 = scmp.ne.s32.totalorder %s388_s1, %s263_s28  ;;  %p267_p9 = scmp.lt.u32.totalorder %s263_s28, %s388_s1 }
  0x16   :  { %p269_p10 = pnand %p267_p9, %p264_p8 }
  0x18   :  { %272 = shalt.err (!%p269_p10)
}
  0x19   :  { %s273_s6 = scalar_lea.vmem %s341_s15, 2048  ;;  %p278_p12 = scmp.lt.s32.totalorder %s341_s15, %s341_s15 }
  0x1a   :  { %p274_p11 = scmp.ne.s32.totalorder %s341_s15, %s273_s6  ;;  %p279_p13 = scmp.lt.s32.totalorder %s273_s6, %s273_s6 }
  0x1c   :  { %p280_p0 = por %p279_p13, %p278_p12 }
  0x1e   :  { %p281_p1 = pnand %p280_p0, %p274_p11 }
  0x20   :  { %284 = shalt.err (!%p281_p1)
}
  0x21   :  { %s315_s0 = smov 128   ;;  %s316_s7 = smov 8  }
  0x22   :  { %32 = dma.hbm_to_vmem [thread:$0]  %s388_s1, 2048, %s341_s15, [#allocation6], %s315_s0, %s315_s0, %s316_s7  }
  0x23   :  { %307 = dma.done.wait [#allocation3], 128  }
  0x24   :  { %308 = vsyncadd [#allocation3], 4294967168 }
  0x25   :  { %309 = dma.done.wait [#allocation6], 2048  }
  0x26   :  { %310 = vsyncadd [#allocation6], 4294965248  ;;  %v317_v0 = vmov 0.0|0.0   ;;  %vm318_vm0 = vmmov 0   ;;  %v319_v1 = vmov 0.0   ;;  %v42_v2 = vld [vmem:[#allocation5] sm:$0xff] }
  0x27   :  { %209 = vmatprep.subr.bf16.mxu0 %v317_v0  ;;  %206 = vmatprep.mubr.msk.f32.mxu0 %vm318_vm0, %v319_v1  ;;  %v43_v3 = vld [vmem:[#allocation5 + $0x8] sm:$0xff]  ;;  %v44_v5 = vld [vmem:[#allocation5 + $0x10] sm:$0xff]  ;;  %v45_v6 = vld [vmem:[#allocation5 + $0x18] sm:$0xff]  ;;  %s320_s11 = smov [#allocation7]  }
  0x28   :  { %v210_v4 = vpack.c.bf16 %v43_v3, %v42_v2  ;;  %v213_v7 = vpack.c.bf16 %v45_v6, %v44_v5  ;;  %v46_v8 = vld [vmem:[#allocation5 + $0x20] sm:$0xff]  ;;  %v47_v9 = vld [vmem:[#allocation5 + $0x28] sm:$0xff]  ;;  %v48_v11 = vld [vmem:[#allocation5 + $0x30] sm:$0xff]  ;;  %s146_s12 = sshll.u32 %s320_s11, 4  ;;  %s147_s12 = int_to_ptr.vmem [resolvable:$true] %s146_s12 }
  0x29   :  { %v216_v10 = vpack.c.bf16 %v47_v9, %v46_v8  ;;  %v49_v12 = vld [vmem:[#allocation5 + $0x38] sm:$0xff]  ;;  %v50_v14 = vld [vmem:[#allocation5 + $0x40] sm:$0xff]  ;;  %v51_v15 = vld [vmem:[#allocation5 + $0x48] sm:$0xff]  ;;  %s285_s13 = scalar_lea.vmem %s147_s12, 128  ;;  %p290_p3 = scmp.lt.s32.totalorder %s147_s12, %s147_s12 }
  0x2a   :  { %211 = vmatpush3.bf16.xpose.msra.mxu0 %v210_v4  ;;  %v219_v13 = vpack.c.bf16 %v49_v12, %v48_v11  ;;  %v222_v16 = vpack.c.bf16 %v51_v15, %v50_v14  ;;  %v52_v17 = vld [vmem:[#allocation5 + $0x50] sm:$0xff]  ;;  %v53_v18 = vld [vmem:[#allocation5 + $0x58] sm:$0xff]  ;;  %v54_v20 = vld [vmem:[#allocation5 + $0x60] sm:$0xff]  ;;  %p286_p2 = scmp.ne.s32.totalorder %s147_s12, %s285_s13  ;;  %p291_p4 = scmp.lt.s32.totalorder %s285_s13, %s285_s13 }
  0x2b   :  { %212 = vmatprep.subr.bf16.mxu0 %v317_v0  ;;  %v225_v19 = vpack.c.bf16 %v53_v18, %v52_v17  ;;  %v55_v21 = vld [vmem:[#allocation5 + $0x68] sm:$0xff]  ;;  %v56_v23 = vld [vmem:[#allocation5 + $0x70] sm:$0xff]  ;;  %v57_v24 = vld [vmem:[#allocation5 + $0x78] sm:$0xff] }
  0x2c   :  { %v228_v22 = vpack.c.bf16 %v55_v21, %v54_v20  ;;  %v231_v25 = vpack.c.bf16 %v57_v24, %v56_v23  ;;  %v41_v26 = vld [vmem:[#allocation2] sm:$0xff]  ;;  %p292_p5 = por %p291_p4, %p290_p3 }
  0x2d   :  { %v156_v27 = vld [vmem:[%s389_s2] ss:$0 sm:$0xff] }
  0x2e   :  { %p293_p6 = pnand %p292_p5, %p286_p2 }
  0x32   :  { %214 = vmatpush3.bf16.xpose.msra.mxu0 %v213_v7 }
  0x33   :  { %215 = vmatprep.subr.bf16.mxu0 %v317_v0 }
  0x3a   :  { %217 = vmatpush3.bf16.xpose.msra.mxu0 %v216_v10 }
  0x3b   :  { %218 = vmatprep.subr.bf16.mxu0 %v317_v0 }
  0x42   :  { %220 = vmatpush3.bf16.xpose.msra.mxu0 %v219_v13 }
  0x43   :  { %221 = vmatprep.subr.bf16.mxu0 %v317_v0 }
  0x4a   :  { %223 = vmatpush3.bf16.xpose.msra.mxu0 %v222_v16 }
  0x4b   :  { %224 = vmatprep.subr.bf16.mxu0 %v317_v0 }
  0x52   :  { %226 = vmatpush3.bf16.xpose.msra.mxu0 %v225_v19 }
  0x53   :  { %227 = vmatprep.subr.bf16.mxu0 %v317_v0 }
  0x5a   :  { %229 = vmatpush3.bf16.xpose.msra.mxu0 %v228_v22 }
  0x5b   :  { %230 = vmatprep.subr.bf16.mxu0 %v317_v0 }
  0x62   :  { %232 = vmatpush3.bf16.xpose.msra.mxu0 %v231_v25 }
  0x69   :  { %207 = vmatmul.mubr.f32.vlgmr.msra.gmra.mrb[0].mxu0 %v41_v26 }
 0x13c   :  { %v131_v28 = vpop.f32.mrb[0].mxu0 }
 0x13d   :  { %v132_v29 = vadd.f32 %v156_v27, %v131_v28  ;;  %v208_v30 = vpop.f32.mrb[1].mxu0 }
 0x13f   :  { %vm135_vm1 = vcmp.gt.f32.partialorder %v132_v29, 0.0  ;;  %v136_v31 = vmul.f32 0.01, %v132_v29 }
 0x141   :  { %v137_v32 = vsel %vm135_vm1, %v132_v29, %v136_v31 }
 0x142   :  { %v138_v33 = vadd.f32 %v137_v32, %v41_v26 }
 0x144   :  { %139 = vst [vmem:[#allocation7] sm:$0xff] %v138_v33 }
 0x145   :  { %296 = shalt.err (!%p293_p6)
}
 0x146   :  { %s297_s15 = scalar_lea.hbm %s390_s3, 128 }
 0x147   :  { %p298_p7 = scmp.ne.s32.totalorder %s390_s3, %s297_s15  ;;  %p301_p8 = scmp.lt.u32.totalorder %s297_s15, %s390_s3 }
 0x149   :  { %p303_p9 = pnand %p301_p8, %p298_p7 }
 0x14b   :  { %306 = shalt.err (!%p303_p9)
}
 0x14c   :  { %149 = dma.vmem_to_hbm [thread:$0]  %s147_s12, 128, %s390_s3, [#allocation4]  }
 0x14d   :  { %311 = dma.done.wait [#allocation4], 128  }
 0x14e   :  { %312 = vsyncadd [#allocation4], 4294967168 }
 0x14f   :  { %153 = vsyncpa [#allocation3], 1 }
 0x150   :  { %154 = vsyncpa [#allocation6], 1 }
 0x151   :  { %155 = vsyncpa [#allocation4], 1 }

</bundles_post_ra>
